<compile_context>
chip_gen: v7x
topology: tpu7x:2x2x1
jax: 0.10.0
libtpu: 0.0.40
codegen_flags: <defaults>
</compile_context>

<pallas_src>
import functools

import jax
import jax.numpy as jnp
from jax import lax
from jax.experimental import pallas as pl
from jax.experimental.pallas import tpu as pltpu

_LANE = 128
_SUBLANE = 8
_EPS = 1e-8
_CHUNK_ROWS = 256                     # inner-loop chunk: bounds vreg pressure
_TARGET_BLOCK_BYTES = 4 * 1024 * 1024  # per-input, per-pipeline-buffer
_NUM_CORES = 2                        # v7x has 2 TCs; no-op split on v5e/v6e


def _round_up(x: int, m: int) -> int:
    return ((x + m - 1) // m) * m


def _rmsre_kernel(p_ref, t_ref, out_ref, *,
                  tile_rows, chunk_rows, tiles_per_core, rows_hbm):
    """Grid = (core_split, tiles_per_core); accumulate err into an (8,128) block."""
    c = pl.program_id(0)
    j = pl.program_id(1)
    t_idx = c * tiles_per_core + j          # global tile index (unclamped)

    @pl.when(j == 0)
    def _init():
        out_ref[...] = jnp.zeros_like(out_ref)

    n_chunks = tile_rows // chunk_rows

    def accumulate(masked):
        def body(g, carry):
            r0 = pl.multiple_of(g * chunk_rows, chunk_rows)
            p = p_ref[pl.ds(r0, chunk_rows), :].astype(jnp.float32)
            t = t_ref[pl.ds(r0, chunk_rows), :].astype(jnp.float32)
            if masked:
                # Rows of this tile that exist in HBM (covers both the ragged
                # last tile and fully-out-of-range duplicate tiles from the
                # clamped index_map).  Masking the INPUTS to 1.0 gives an
                # exact zero error, so garbage can never produce inf/NaN.
                valid_rows = rows_hbm - t_idx * tile_rows
                row = lax.broadcasted_iota(jnp.int32, p.shape, 0) + r0
                ok = row < valid_rows
                one = jnp.float32(1.0)
                p = jnp.where(ok, p, one)
                t = jnp.where(ok, t, one)
            diff = p - t
            err = (diff * diff) * pl.reciprocal(t * t + jnp.float32(_EPS),
                                                approx=False)
            # Fold (chunk_rows, 128) into the resident (8,128) partial sum:
            # pure VPU vreg adds, no cross-lane work until the wrapper.
            out_ref[...] += jnp.sum(err.reshape(-1, _SUBLANE, _LANE), axis=0)
            return carry

        lax.fori_loop(0, n_chunks, body, 0)

    tile_full = (t_idx + 1) * tile_rows <= rows_hbm

    @pl.when(tile_full)
    def _full():
        accumulate(False)

    @pl.when(jnp.logical_not(tile_full))
    def _partial():
        accumulate(True)


@jax.jit
def rmsre_loss(predictions: jax.Array, targets: jax.Array) -> jax.Array:
    assert predictions.shape == targets.shape, "shapes must match"
    n = predictions.size
    assert n > 0

    p = predictions.reshape(-1)
    t = targets.reshape(-1)

    if n % _LANE:
        # Only when n is not lane-aligned: pad up to whole (8,128) vreg rows.
        # Pad value 1.0 -> (1-1)^2/(1+eps) == 0, so pads contribute nothing.
        n_padded = _round_up(n, _SUBLANE * _LANE)
        p = jnp.pad(p, (0, n_padded - n), constant_values=1)
        t = jnp.pad(t, (0, n_padded - n), constant_values=1)

    rows = p.size // _LANE
    p2 = p.reshape(rows, _LANE)
    t2 = t.reshape(rows, _LANE)

    # Tile sizing: target 4 MiB per input block (bf16 automatically gets 2x
    # the rows), chunked internally; small inputs collapse to a single tile.
    itemsize = jnp.dtype(predictions.dtype).itemsize
    max_tile_rows = max(_CHUNK_ROWS, _TARGET_BLOCK_BYTES // (_LANE * itemsize))
    if rows <= _CHUNK_ROWS:
        tile_rows = _round_up(rows, _SUBLANE)
        chunk_rows = tile_rows
    else:
        tile_rows = min(max_tile_rows, _round_up(rows, _CHUNK_ROWS))
        chunk_rows = _CHUNK_ROWS

    num_tiles = pl.cdiv(rows, tile_rows)
    tiles_per_core = pl.cdiv(num_tiles, _NUM_CORES)

    def in_map(c, j):
        # Clamp so duplicate/phantom tiles re-read a valid block; their
        # contribution is zeroed by the in-kernel row mask.
        return (jnp.minimum(c * tiles_per_core + j, num_tiles - 1), 0)

    kernel = functools.partial(
        _rmsre_kernel,
        tile_rows=tile_rows,
        chunk_rows=chunk_rows,
        tiles_per_core=tiles_per_core,
        rows_hbm=rows,
    )

    partial_sums = pl.pallas_call(
        kernel,
        out_shape=jax.ShapeDtypeStruct((_NUM_CORES * _SUBLANE, _LANE),
                                       jnp.float32),
        grid=(_NUM_CORES, tiles_per_core),
        in_specs=[
            pl.BlockSpec((tile_rows, _LANE), in_map),
            pl.BlockSpec((tile_rows, _LANE), in_map),
        ],
        out_specs=pl.BlockSpec((_SUBLANE, _LANE), lambda c, j: (c, 0)),
        compiler_params=pltpu.CompilerParams(
            dimension_semantics=("parallel", "arbitrary"),
            vmem_limit_bytes=32 * 1024 * 1024,
        ),
    )(p2, t2)

    # Tiny epilogue: cross-core + cross-lane sum, mean over the TRUE n, sqrt.
    return jnp.sqrt(jnp.sum(partial_sums) / n)


def _rmsre_ref(predictions, targets):
    p = predictions.astype(jnp.float32)
    t = targets.astype(jnp.float32)
    err = (p - t) ** 2 / (t * t + _EPS)
    return jnp.sqrt(jnp.mean(err))


if __name__ == "__main__":
    key = jax.random.PRNGKey(0)
    k1, k2 = jax.random.split(key)

    # Primary check: lane-aligned shape (zero-copy streaming path).
    shape = (2, 4, 16, 16)
    predictions = jax.random.uniform(k1, shape, jnp.float32, 0.5, 5.0)
    targets = jax.random.uniform(k2, shape, jnp.float32, 0.5, 5.0)
    loss = rmsre_loss(predictions, targets)
    jax.block_until_ready(loss)
    ref = _rmsre_ref(predictions, targets)
    assert jnp.allclose(loss, ref, rtol=1e-5, atol=1e-6), (loss, ref)

    # Secondary check: ragged shape (exercises pad-with-ones + row masking).
    k3, k4 = jax.random.split(k2)
    shape2 = (7, 37)
    p2 = jax.random.uniform(k3, shape2, jnp.float32, 0.5, 5.0)
    t2 = jax.random.uniform(k4, shape2, jnp.float32, 0.5, 5.0)
    loss2 = rmsre_loss(p2, t2)
    jax.block_until_ready(loss2)
    ref2 = _rmsre_ref(p2, t2)
    assert jnp.allclose(loss2, ref2, rtol=1e-5, atol=1e-6), (loss2, ref2)

    print("KERNEL_OK")
</pallas_src>

<mosaic_0001>
module attributes {stable_mosaic.version = 11 : i64} {
  func.func @_rmsre_kernel(%arg0: i32, %arg1: i32, %arg2: memref<16x128xf32, #tpu.memory_space<vmem>>, %arg3: memref<16x128xf32, #tpu.memory_space<vmem>>, %arg4: memref<8x128xf32, #tpu.memory_space<vmem>>) attributes {dimension_semantics = [#tpu.dimension_semantics<parallel>, #tpu.dimension_semantics<arbitrary>], iteration_bounds = array<i64: 2, 1>, scalar_prefetch = 0 : i64, scratch_operands = 0 : i64, tpu.core_type = #tpu.core_type<tc>, window_params = [{transform_indices = @transform_0, window_bounds = array<i64: 16, 128>}, {transform_indices = @transform_1, window_bounds = array<i64: 16, 128>}, {transform_indices = @transform_2, window_bounds = array<i64: 8, 128>}]} {
    %c1_i32 = arith.constant 1 : i32
    %0 = arith.muli %arg0, %c1_i32 : i32
    %1 = arith.addi %0, %arg1 : i32
    %c0_i32 = arith.constant 0 : i32
    %2 = arith.cmpi eq, %arg1, %c0_i32 : i32
    %3 = arith.extui %2 : i1 to i32
    %c0_i32_0 = arith.constant 0 : i32
    %4 = arith.cmpi ne, %3, %c0_i32_0 : i32
    scf.if %4 {
      %cst = arith.constant 0.000000e+00 : f32
      %13 = vector.broadcast %cst : f32 to vector<8x128xf32>
      %c0 = arith.constant 0 : index
      %c0_5 = arith.constant 0 : index
      %14 = vector.load %arg4[%c0, %c0_5] : memref<8x128xf32, #tpu.memory_space<vmem>>, vector<8x128xf32>
      tpu.vector_store %arg4[%c0, %c0_5], %13 {strides = array<i32>} : memref<8x128xf32, #tpu.memory_space<vmem>>, vector<8x128xf32>,
    } else {
    }
    %c1_i32_1 = arith.constant 1 : i32
    %5 = arith.addi %1, %c1_i32_1 : i32
    %c16_i32 = arith.constant 16 : i32
    %6 = arith.muli %5, %c16_i32 : i32
    %c16_i32_2 = arith.constant 16 : i32
    %7 = arith.cmpi sle, %6, %c16_i32_2 : i32
    %8 = arith.extui %7 : i1 to i32
    %c0_i32_3 = arith.constant 0 : i32
    %9 = arith.cmpi ne, %8, %c0_i32_3 : i32
    scf.if %9 {
      %c0_i32_5 = arith.constant 0 : i32
      %c16_i32_6 = arith.constant 16 : i32
      %13 = arith.muli %c0_i32_5, %c16_i32_6 : i32
      %14 = tpu.assume_multiple %13, 16 : i32
      %15 = arith.index_cast %14 : i32 to index
      %c0 = arith.constant 0 : index
      %16 = vector.load %arg2[%15, %c0] : memref<16x128xf32, #tpu.memory_space<vmem>>, vector<16x128xf32>
      %17 = arith.index_cast %14 : i32 to index
      %c0_7 = arith.constant 0 : index
      %18 = vector.load %arg3[%17, %c0_7] : memref<16x128xf32, #tpu.memory_space<vmem>>, vector<16x128xf32>
      %19 = arith.subf %16, %18 : vector<16x128xf32>
      %20 = arith.mulf %19, %19 : vector<16x128xf32>
      %21 = arith.mulf %18, %18 : vector<16x128xf32>
      %cst = arith.constant 9.99999993E-9 : f32
      %22 = vector.broadcast %cst : f32 to vector<16x128xf32>
      %23 = arith.addf %21, %22 : vector<16x128xf32>
      %24 = tpu.reciprocal %23 : vector<16x128xf32> -> vector<16x128xf32>
      %25 = arith.mulf %20, %24 : vector<16x128xf32>
      %c0_8 = arith.constant 0 : index
      %c0_9 = arith.constant 0 : index
      %26 = vector.load %arg4[%c0_8, %c0_9] : memref<8x128xf32, #tpu.memory_space<vmem>>, vector<8x128xf32>
      %27 = vector.shape_cast %25 : vector<16x128xf32> to vector<2x8x128xf32>
      %cst_10 = arith.constant dense<0.000000e+00> : vector<8x128xf32>
      %28 = vector.multi_reduction <add>, %27, %cst_10 [0] : vector<2x8x128xf32> to vector<8x128xf32>
      %29 = arith.addf %26, %28 : vector<8x128xf32>
      %c0_11 = arith.constant 0 : index
      %c0_12 = arith.constant 0 : index
      %30 = vector.load %arg4[%c0_11, %c0_12] : memref<8x128xf32, #tpu.memory_space<vmem>>, vector<8x128xf32>
      tpu.vector_store %arg4[%c0_11, %c0_12], %29 {strides = array<i32>} : memref<8x128xf32, #tpu.memory_space<vmem>>, vector<8x128xf32>,
      %c1_i32_13 = arith.constant 1 : i32
    } else {
    }
    %true = arith.constant true
    %10 = arith.xori %7, %true : i1
    %11 = arith.extui %10 : i1 to i32
    %c0_i32_4 = arith.constant 0 : i32
    %12 = arith.cmpi ne, %11, %c0_i32_4 : i32
    scf.if %12 {
      %c0_i32_5 = arith.constant 0 : i32
      %c16_i32_6 = arith.constant 16 : i32
      %13 = arith.muli %c0_i32_5, %c16_i32_6 : i32
      %14 = tpu.assume_multiple %13, 16 : i32
      %15 = arith.index_cast %14 : i32 to index
      %c0 = arith.constant 0 : index
      %16 = vector.load %arg2[%15, %c0] : memref<16x128xf32, #tpu.memory_space<vmem>>, vector<16x128xf32>
      %17 = arith.index_cast %14 : i32 to index
      %c0_7 = arith.constant 0 : index
      %18 = vector.load %arg3[%17, %c0_7] : memref<16x128xf32, #tpu.memory_space<vmem>>, vector<16x128xf32>
      %c16_i32_8 = arith.constant 16 : i32
      %19 = arith.muli %1, %c16_i32_8 : i32
      %c16_i32_9 = arith.constant 16 : i32
      %20 = arith.subi %c16_i32_9, %19 : i32
      %21 = tpu.iota {dimensions = array<i32: 0>} : vector<16x128xi32>
      %22 = vector.broadcast %14 : i32 to vector<16x128xi32>
      %23 = arith.addi %21, %22 : vector<16x128xi32>
      %24 = vector.broadcast %20 : i32 to vector<16x128xi32>
      %25 = arith.cmpi slt, %23, %24 : vector<16x128xi32>
      %cst = arith.constant 1.000000e+00 : f32
      %26 = vector.broadcast %cst : f32 to vector<16x128xf32>
      %27 = arith.select %25, %16, %26 : vector<16x128xi1>, vector<16x128xf32>
      %cst_10 = arith.constant 1.000000e+00 : f32
      %28 = vector.broadcast %cst_10 : f32 to vector<16x128xf32>
      %29 = arith.select %25, %18, %28 : vector<16x128xi1>, vector<16x128xf32>
      %30 = arith.subf %27, %29 : vector<16x128xf32>
      %31 = arith.mulf %30, %30 : vector<16x128xf32>
      %32 = arith.mulf %29, %29 : vector<16x128xf32>
      %cst_11 = arith.constant 9.99999993E-9 : f32
      %33 = vector.broadcast %cst_11 : f32 to vector<16x128xf32>
      %34 = arith.addf %32, %33 : vector<16x128xf32>
      %35 = tpu.reciprocal %34 : vector<16x128xf32> -> vector<16x128xf32>
      %36 = arith.mulf %31, %35 : vector<16x128xf32>
      %c0_12 = arith.constant 0 : index
      %c0_13 = arith.constant 0 : index
      %37 = vector.load %arg4[%c0_12, %c0_13] : memref<8x128xf32, #tpu.memory_space<vmem>>, vector<8x128xf32>
      %38 = vector.shape_cast %36 : vector<16x128xf32> to vector<2x8x128xf32>
      %cst_14 = arith.constant dense<0.000000e+00> : vector<8x128xf32>
      %39 = vector.multi_reduction <add>, %38, %cst_14 [0] : vector<2x8x128xf32> to vector<8x128xf32>
      %40 = arith.addf %37, %39 : vector<8x128xf32>
      %c0_15 = arith.constant 0 : index
      %c0_16 = arith.constant 0 : index
      %41 = vector.load %arg4[%c0_15, %c0_16] : memref<8x128xf32, #tpu.memory_space<vmem>>, vector<8x128xf32>
      tpu.vector_store %arg4[%c0_15, %c0_16], %40 {strides = array<i32>} : memref<8x128xf32, #tpu.memory_space<vmem>>, vector<8x128xf32>,
      %c1_i32_17 = arith.constant 1 : i32
    } else {
    }
    return
  }
  func.func @transform_0(%arg0: i32, %arg1: i32) -> (i32, i32) {
    %c1_i32 = arith.constant 1 : i32
    %0 = arith.muli %arg0, %c1_i32 : i32
    %1 = arith.addi %0, %arg1 : i32
    %c0_i32 = arith.constant 0 : i32
    %2 = arith.minsi %1, %c0_i32 : i32
    %c0_i32_0 = arith.constant 0 : i32
    %c0_i32_1 = arith.constant 0 : i32
    return %2, %c0_i32_0 : i32, i32
  }
  func.func @transform_1(%arg0: i32, %arg1: i32) -> (i32, i32) {
    %c1_i32 = arith.constant 1 : i32
    %0 = arith.muli %arg0, %c1_i32 : i32
    %1 = arith.addi %0, %arg1 : i32
    %c0_i32 = arith.constant 0 : i32
    %2 = arith.minsi %1, %c0_i32 : i32
    %c0_i32_0 = arith.constant 0 : i32
    %c0_i32_1 = arith.constant 0 : i32
    return %2, %c0_i32_0 : i32, i32
  }
  func.func @transform_2(%arg0: i32, %arg1: i32) -> (i32, i32) {
    %c0_i32 = arith.constant 0 : i32
    %c0_i32_0 = arith.constant 0 : i32
    return %arg0, %c0_i32 : i32, i32
  }
}

</mosaic_0001>

<bundles_post_ra>
// kernel: rmsre_loss.1
= control target key start
LH: loop header
LB: loop body
LE: loop exit
PB: predicated region body
PF: predicated region fallthrough
CT: control target
= control target key end

     0   :  { %s455_s9 = smov 0   ;;  %s457_s10 = smov 0   ;;  %s525_s0 = inlined_call_operand.vmem [shape: f32[16,128], index: 0, kind: input, shape index: {}]   ;;  %s526_s1 = inlined_call_operand.vmem [shape: f32[16,128], index: 1, kind: input, shape index: {}]   ;;  %s527_s2 = inlined_call_operand.vmem [shape: f32[16,128], index: 2, kind: output, shape index: {}]  }
   0x1   :  { %s459_s11 = smov 0  }
   0x2 LB: > { %s24_s12 = sadd.s32 1, %s433_s10  ;;  %p368_p0 = scmp.ge.s32.totalorder %s437_s11, 1  ;;  %s437_s11 = sphi %s459_s11, %s12_s11   ;;  %s433_s10 = sphi %s457_s10, %s529_s10   ;;  %s429_s9 = sphi %s455_s9, %s528_s9  }
   0x3   : > { %p26_p1 = scmp.ge.s32.totalorder %s24_s12, 2  ;;  %p160_p2 = scmp.lt.s32.totalorder %s437_s11, 3 }
   0x5   : > { %s531_s12 = smov (%p26_p1, %s24_s12), 0  ;;  %p161_p3 = pnand %p368_p0, %p160_p2 }
   0x6   : > { %p193_p4 = scmp.lt.s32.totalorder (!%p161_p3), %s429_s9, 0  ;;  %p216_p5 = scmp.lt.s32.totalorder (!%p161_p3), %s429_s9, 1  ;;  %v439_v0 = vmov (!%p161_p3), 0.0  }
   0x7   : > { %164 = sbr.rel (%p161_p3) target bundleno = 77 (0x4d), region = 28  ;;  %s380_s13 = sshll.u32 (!%p161_p3), %s429_s9, 4 }
   0x8   : > { %s482_s17 = sadd.s32 (!%p161_p3), 16, %s380_s13 }
   0x9   : > { %p375_p7 = scmp.gt.s32.totalorder (!%p161_p3), %s482_s17, 16 }
   0xe   : > { %s194_s14 = scalar_select %p193_p4, %s429_s9, 0 }
   0xf   : > { %s217_s15 = scalar_select %p216_p5, %s429_s9, 1 }
  0x10   : > { %s369_s16 = sshll.u32 %s194_s14, 1  ;;  %231 = sbr.rel (%p375_p7) target bundleno = 46 (0x2e), region = 36 }
  0x11   : > { %p196_p6 = scmp.lt.s32.totalorder %s369_s16, 1  ;;  %s373_s18 = sshll.u32 %s217_s15, 3 }
  0x12   : > { %s487_s21 = scalar_lea.vmem %s527_s2, %s373_s18 }
  0x13   : > { %s533_s16 = smov (!%p196_p6, %s369_s16), 1  ;;  %225 = vst [vmem:[%s487_s21] sm:$0xff] %v439_v0 }
  0x14   : > { %s370_s22 = sshll.u32 %s533_s16, 3 }
  0x15   : > { %s493_s25 = scalar_lea.vmem %s525_s0, %s370_s22  ;;  %s498_s28 = scalar_lea.vmem %s526_s1, %s370_s22 }
  0x16   : > { %v234_v1 = vld [vmem:[%s498_s28] sm:$0xff] (!%p375_p7)  ;;  %v235_v2 = vld [vmem:[%s498_s28 + $0x8] sm:$0xff] (!%p375_p7) }
  0x17   : > { %v240_v3 = vmul.f32 %v234_v1, %v234_v1  ;;  %v241_v4 = vmul.f32 %v235_v2, %v235_v2  ;;  %v232_v7 = vld [vmem:[%s493_s25] sm:$0xff]  ;;  %v233_v8 = vld [vmem:[%s493_s25 + $0x8] sm:$0xff] }
  0x18   : > { %v236_v9 = vsub.f32 %v232_v7, %v234_v1  ;;  %v237_v10 = vsub.f32 %v233_v8, %v235_v2 }
  0x19   : > { %v242_v5 = vadd.f32 1e-08, %v240_v3  ;;  %v243_v6 = vadd.f32 1e-08, %v241_v4 }
  0x1a   : > { %v238_v11 = vmul.f32 %v236_v9, %v236_v9  ;;  %v239_v12 = vmul.f32 %v237_v10, %v237_v10  ;;  %v248_v17 = vld [vmem:[%s487_s21] sm:$0xff] }
  0x1b   : > { %407 = vrcp.f32 %v242_v5 }
  0x1c   : > { %409 = vrcp.f32 %v243_v6 }
  0x25   : > { %v408_v13 = vpop.eup %407 }
  0x26   : > { %v410_v14 = vpop.eup %409  ;;  %v246_v15 = vmul.f32 %v408_v13, %v238_v11 }
  0x27   : > { %v247_v16 = vmul.f32 %v410_v14, %v239_v12 }
  0x29   : > { %v249_v18 = vadd.f32 %v247_v16, %v246_v15 }
  0x2b   : > { %v250_v19 = vadd.f32 %v249_v18, %v248_v17 }
  0x2d   : > { %251 = vst [vmem:[%s487_s21] sm:$0xff] %v250_v19 }
  0x2e PF: > { %p376_p8 = scmp.le.s32.totalorder %s482_s17, 16 }
  0x2f   : > { %s261_s29 = ssub.s32 (!%p376_p8), 16, %s380_s13  ;;  %v262_v20 = vlaneseq (!%p376_p8)  ;;  %v258_v22 = vld [vmem:[%s498_s28] sm:$0xff] (!%p376_p8)  ;;  %v259_v24 = vld [vmem:[%s498_s28 + $0x8] sm:$0xff] (!%p376_p8) }
  0x30   : > { %255 = sbr.rel (%p376_p8) target bundleno = 77 (0x4d), region = 40  ;;  %v268_v21 = vstv (!%p376_p8), %s261_s29  ;;  %v256_v28 = vld [vmem:[%s493_s25] sm:$0xff] (!%p376_p8)  ;;  %v257_v32 = vld [vmem:[%s493_s25 + $0x8] sm:$0xff] (!%p376_p8) }
  0x31   : > { %v263_v23 = vshrl.u32 (!%p376_p8), %v262_v20, 7 }
  0x33   : > { %v264_v25 = vadd.s32 (!%p376_p8), 8, %v263_v23  ;;  %vm269_vm0 = vcmp.lt.s32.totalorder (!%p376_p8), %v263_v23, %v268_v21 }
  0x34   : > { %v273_v26 = vsel (!%p376_p8), %vm269_vm0, %v258_v22, 1.0  ;;  %v271_v33 = vsel (!%p376_p8), %vm269_vm0, %v256_v28, 1.0  ;;  %v287_v44 = vld [vmem:[%s487_s21] sm:$0xff] (!%p376_p8) }
  0x35   : > { %vm270_vm1 = vcmp.lt.s32.totalorder (!%p376_p8), %v264_v25, %v268_v21  ;;  %v279_v27 = vmul.f32 (!%p376_p8), %v273_v26, %v273_v26  ;;  %v275_v36 = vsub.f32 (!%p376_p8), %v271_v33, %v273_v26 }
  0x36   : > { %v274_v29 = vsel (!%p376_p8), %vm270_vm1, %v259_v24, 1.0  ;;  %v272_v35 = vsel (!%p376_p8), %vm270_vm1, %v257_v32, 1.0 }
  0x37   : > { %v280_v30 = vmul.f32 %v274_v29, %v274_v29  ;;  %v281_v31 = vadd.f32 1e-08, %v279_v27  ;;  %v276_v37 = vsub.f32 %v272_v35, %v274_v29  ;;  %v277_v38 = vmul.f32 %v275_v36, %v275_v36 }
  0x39   : > { %v282_v34 = vadd.f32 1e-08, %v280_v30  ;;  %411 = vrcp.f32 %v281_v31  ;;  %v278_v39 = vmul.f32 %v276_v37, %v276_v37 }
  0x3b   : > { %413 = vrcp.f32 %v282_v34 }
  0x43   : > { %v412_v40 = vpop.eup %411 }
  0x44   : > { %v285_v41 = vmul.f32 %v412_v40, %v277_v38 }
  0x45   : > { %v414_v42 = vpop.eup %413 }
  0x46   : > { %v286_v43 = vmul.f32 %v414_v42, %v278_v39 }
  0x48   : > { %v288_v45 = vadd.f32 %v286_v43, %v285_v41 }
  0x4a   : > { %v289_v46 = vadd.f32 %v288_v45, %v287_v44 }
  0x4c   : > { %290 = vst [vmem:[%s487_s21] sm:$0xff] %v289_v46 }
  0x4d PF: > { %s12_s11 = sadd.s32 1, %s437_s11   ;;  %s528_s9 = smov %s433_s10 }
  0x4e   : > { %p9_p9 = scmp.ge.s32.totalorder %s12_s11, 4   ;;  %s529_s10 = smov %s531_s12 }
  0x50   :  { %11 = sbr.rel (!%p9_p9) target bundleno = 2 (0x2), region = 73 }

</bundles_post_ra>
